<compile_context>
chip_gen: v5e
topology: v5e:2x2
jax: 0.10.0
libtpu: 0.0.40
codegen_flags: <defaults>
</compile_context>

<pallas_src>
import functools
import math

import jax
import jax.numpy as jnp
from jax.experimental import pallas as pl
from jax.experimental.pallas import tpu as pltpu


_MASK_VALUE = -9.0e15  # matches the PyTorch module's zero_vec


def _round_up(v, m):
    return ((v + m - 1) // m) * m


def _node_attention_kernel(s_src_ref, s_dst_ref, bias_ref, h_ref, o_ref,
                           m_sc, l_sc, acc_sc, *, negative_slope, concat):
    # s_src_ref: (tq, 1)   f32   h_q . a_src   (precomputed, query tile)
    # s_dst_ref: (1, tkv)  f32   h_kv . a_dst  (precomputed, kv tile)
    # bias_ref:  (tq, tkv) bf16  0 on edges, -9e15 elsewhere (incl. padding)
    # h_ref:     (tkv, F_pad)    value rows, native dtype
    # o_ref:     (tq, F_pad)
    kv = pl.program_id(1)

    @pl.when(kv == 0)
    def _():
        m_sc[...] = jnp.full_like(m_sc, -jnp.inf)
        l_sc[...] = jnp.zeros_like(l_sc)
        acc_sc[...] = jnp.zeros_like(acc_sc)

    # Logits via the exact identity cat([h_i, h_j]) @ a = s_src[i] + s_dst[j];
    # LeakyReLU, then the additive adjacency mask (== where(adj>0, e, -9e15)).
    e = s_src_ref[...] + s_dst_ref[...]                       # (tq, tkv) f32
    e = jnp.where(e >= 0.0, e, negative_slope * e)            # LeakyReLU
    e = e + bias_ref[...].astype(jnp.float32)

    # Online (flash-style) softmax over the kv axis.
    m_prev = m_sc[...]
    m_new = jnp.maximum(m_prev, jnp.max(e, axis=-1, keepdims=True))
    alpha = jnp.exp(m_prev - m_new)
    p = jnp.exp(e - m_new)
    l_sc[...] = alpha * l_sc[...] + jnp.sum(p, axis=-1, keepdims=True)
    acc_sc[...] = alpha * acc_sc[...] + jnp.dot(
        p.astype(h_ref.dtype), h_ref[...], preferred_element_type=jnp.float32)
    m_sc[...] = m_new

    @pl.when(kv == pl.num_programs(1) - 1)
    def _():
        out = acc_sc[...] * pl.reciprocal(l_sc[...], approx=False)
        if concat:
            out = jnp.where(out >= 0.0, out, negative_slope * out)
        o_ref[...] = out.astype(o_ref.dtype)


def node_attention(x, adj, weight, a, *, concat=True, negative_slope=0.01,
                   tile_q=None, tile_kv=None):
    """x: (N, in_ft), adj: (N, N), weight: (in_ft, F), a: (2F, 1) -> (N, F)."""
    n, in_ft = x.shape
    out_ft = weight.shape[1]
    assert weight.shape == (in_ft, out_ft)
    assert adj.shape == (n, n)
    assert a.shape == (2 * out_ft, 1)
    dtype = x.dtype

    # ---- hoisted projections: done ONCE, outside the grid loop (wrapper XLA ops) ----
    h = jnp.dot(x, weight)                                              # (N, F)
    s_src = jnp.dot(h, a[:out_ft, :], preferred_element_type=jnp.float32)   # (N, 1)
    s_dst = jnp.dot(h, a[out_ft:, :], preferred_element_type=jnp.float32).T  # (1, N)

    # ---- tiling: lane-dense feature dim, (8,128)-aligned node tiles ----
    f_pad = _round_up(out_ft, 128)
    if n <= 256:
        tq_d = tkv_d = _round_up(n, 8)       # single block per axis
    else:
        tq_d, tkv_d = 256, 512
    tq = tile_q if tile_q is not None else tq_d
    tkv = tile_kv if tile_kv is not None else tkv_d
    n_pad = _round_up(n, tq * tkv // math.gcd(tq, tkv))
    assert tq % 8 == 0
    assert tkv % 128 == 0 or tkv == n_pad

    # ---- padded operands; padded rows/cols are masked through the bias ----
    h_p = jnp.zeros((n_pad, f_pad), dtype).at[:n, :out_ft].set(h.astype(dtype))
    s_src_p = jnp.zeros((n_pad, 1), jnp.float32).at[:n, :].set(s_src)
    s_dst_p = jnp.zeros((1, n_pad), jnp.float32).at[:, :n].set(s_dst)
    bias_core = jnp.where(adj > 0, 0.0, _MASK_VALUE).astype(jnp.bfloat16)
    bias_p = jnp.full((n_pad, n_pad), _MASK_VALUE, jnp.bfloat16).at[:n, :n].set(bias_core)

    grid = (n_pad // tq, n_pad // tkv)
    kernel = functools.partial(_node_attention_kernel,
                               negative_slope=negative_slope, concat=concat)
    out = pl.pallas_call(
        kernel,
        out_shape=jax.ShapeDtypeStruct((n_pad, f_pad), dtype),
        grid_spec=pltpu.PrefetchScalarGridSpec(
            num_scalar_prefetch=0,
            grid=grid,
            in_specs=[
                pl.BlockSpec((tq, 1), lambda i, k: (i, 0)),       # s_src (query tile)
                pl.BlockSpec((1, tkv), lambda i, k: (0, k)),      # s_dst (kv tile)
                pl.BlockSpec((tq, tkv), lambda i, k: (i, k)),     # adjacency bias
                pl.BlockSpec((tkv, f_pad), lambda i, k: (k, 0)),  # h (value rows)
            ],
            out_specs=pl.BlockSpec((tq, f_pad), lambda i, k: (i, 0)),
            scratch_shapes=[
                pltpu.VMEM((tq, 1), jnp.float32),        # running max
                pltpu.VMEM((tq, 1), jnp.float32),        # running denom
                pltpu.VMEM((tq, f_pad), jnp.float32),    # output accumulator
            ],
        ),
        compiler_params=pltpu.CompilerParams(
            dimension_semantics=("parallel", "arbitrary"),
            vmem_limit_bytes=48 * 1024 * 1024),
    )(s_src_p, s_dst_p, bias_p, h_p)
    return out[:n, :out_ft]


def _reference(x, adj, weight, a, *, concat=True, negative_slope=0.01):
    """Pure-JAX reference mirroring the PyTorch forward (incl. the repeat/cat build)."""
    h = x @ weight
    n, f = h.shape
    a_input = jnp.concatenate(
        [jnp.repeat(h, n, axis=0), jnp.tile(h, (n, 1))], axis=1
    ).reshape(n, n, 2 * f)
    e = jax.nn.leaky_relu(a_input @ a[:, 0], negative_slope)
    e = jnp.where(adj > 0, e, _MASK_VALUE)
    attn = jax.nn.softmax(e, axis=1)
    h_prime = attn @ h
    return jax.nn.leaky_relu(h_prime, negative_slope) if concat else h_prime


def _make_inputs(key, n_nodes, in_ft, out_ft):
    kx, kadj, kw, ka = jax.random.split(key, 4)
    gain = 1.414
    bw = gain * (6.0 / (in_ft + out_ft)) ** 0.5
    weight = jax.random.uniform(kw, (in_ft, out_ft), jnp.float32, -bw, bw)
    ba = gain * (6.0 / (2 * out_ft + 1)) ** 0.5
    a = jax.random.uniform(ka, (2 * out_ft, 1), jnp.float32, -ba, ba)
    x = jax.random.normal(kx, (n_nodes, in_ft), jnp.float32)
    adj = (jax.random.uniform(kadj, (n_nodes, n_nodes)) > 0.5).astype(jnp.float32)
    adj = jnp.maximum(adj, jnp.eye(n_nodes, dtype=jnp.float32))  # self loops
    return x, adj, weight, a


if __name__ == "__main__":
    k1, k2 = jax.random.split(jax.random.PRNGKey(0))

    # Small single-tile case (module-typical shapes).
    x, adj, weight, a = _make_inputs(k1, 8, 32, 32)
    out = jax.block_until_ready(node_attention(x, adj, weight, a, concat=True))
    ref = _reference(x, adj, weight, a, concat=True)
    assert out.shape == (8, 32)
    assert jnp.allclose(out, ref, atol=1e-3, rtol=1e-3), "mismatch vs reference (small)"

    # Multi-tile case exercising the online-softmax kv tiling + N/F padding path.
    x2, adj2, w2, a2 = _make_inputs(k2, 160, 32, 32)
    out2 = jax.block_until_ready(
        node_attention(x2, adj2, w2, a2, concat=True, tile_q=64, tile_kv=128))
    ref2 = _reference(x2, adj2, w2, a2, concat=True)
    assert out2.shape == (160, 32)
    assert jnp.allclose(out2, ref2, atol=1e-3, rtol=1e-3), "mismatch vs reference (tiled)"

    print("KERNEL_OK")
</pallas_src>

<mosaic_0001>
module attributes {stable_mosaic.version = 11 : i64} {
  func.func @_node_attention_kernel(%arg0: i32, %arg1: i32, %arg2: memref<8x1xf32, #tpu.memory_space<vmem>>, %arg3: memref<1x8xf32, #tpu.memory_space<vmem>>, %arg4: memref<8x8xbf16, #tpu.memory_space<vmem>>, %arg5: memref<8x128xf32, #tpu.memory_space<vmem>>, %arg6: memref<8x128xf32, #tpu.memory_space<vmem>>, %arg7: memref<8x1xf32, #tpu.memory_space<vmem>>, %arg8: memref<8x1xf32, #tpu.memory_space<vmem>>, %arg9: memref<8x128xf32, #tpu.memory_space<vmem>>) attributes {dimension_semantics = [#tpu.dimension_semantics<parallel>, #tpu.dimension_semantics<arbitrary>], iteration_bounds = array<i64: 1, 1>, scalar_prefetch = 0 : i64, scratch_operands = 3 : i64, tpu.core_type = #tpu.core_type<tc>, window_params = [{transform_indices = @transform_0, window_bounds = array<i64: 8, 1>}, {transform_indices = @transform_1, window_bounds = array<i64: 1, 8>}, {transform_indices = @transform_2, window_bounds = array<i64: 8, 8>}, {transform_indices = @transform_3, window_bounds = array<i64: 8, 128>}, {transform_indices = @transform_4, window_bounds = array<i64: 8, 128>}]} {
    %c0_i32 = arith.constant 0 : i32
    %0 = arith.cmpi eq, %arg1, %c0_i32 : i32
    %1 = arith.extui %0 : i1 to i32
    %c0_i32_0 = arith.constant 0 : i32
    %2 = arith.cmpi ne, %1, %c0_i32_0 : i32
    scf.if %2 {
      %cst_26 = arith.constant 0xFF800000 : f32
      %42 = vector.broadcast %cst_26 : f32 to vector<8x1xf32>
      %c0_27 = arith.constant 0 : index
      %c0_28 = arith.constant 0 : index
      %43 = vector.load %arg7[%c0_27, %c0_28] : memref<8x1xf32, #tpu.memory_space<vmem>>, vector<8x1xf32>
      tpu.vector_store %arg7[%c0_27, %c0_28], %42 {strides = array<i32>} : memref<8x1xf32, #tpu.memory_space<vmem>>, vector<8x1xf32>,
      %cst_29 = arith.constant 0.000000e+00 : f32
      %44 = vector.broadcast %cst_29 : f32 to vector<8x1xf32>
      %c0_30 = arith.constant 0 : index
      %c0_31 = arith.constant 0 : index
      %45 = vector.load %arg8[%c0_30, %c0_31] : memref<8x1xf32, #tpu.memory_space<vmem>>, vector<8x1xf32>
      tpu.vector_store %arg8[%c0_30, %c0_31], %44 {strides = array<i32>} : memref<8x1xf32, #tpu.memory_space<vmem>>, vector<8x1xf32>,
      %cst_32 = arith.constant 0.000000e+00 : f32
      %46 = vector.broadcast %cst_32 : f32 to vector<8x128xf32>
      %c0_33 = arith.constant 0 : index
      %c0_34 = arith.constant 0 : index
      %47 = vector.load %arg9[%c0_33, %c0_34] : memref<8x128xf32, #tpu.memory_space<vmem>>, vector<8x128xf32>
      tpu.vector_store %arg9[%c0_33, %c0_34], %46 {strides = array<i32>} : memref<8x128xf32, #tpu.memory_space<vmem>>, vector<8x128xf32>,
    } else {
    }
    %c0 = arith.constant 0 : index
    %c0_1 = arith.constant 0 : index
    %3 = vector.load %arg2[%c0, %c0_1] : memref<8x1xf32, #tpu.memory_space<vmem>>, vector<8x1xf32>
    %c0_2 = arith.constant 0 : index
    %c0_3 = arith.constant 0 : index
    %4 = vector.load %arg3[%c0_2, %c0_3] : memref<1x8xf32, #tpu.memory_space<vmem>>, vector<1x8xf32>
    %5 = vector.broadcast %3 : vector<8x1xf32> to vector<8x8xf32>
    %6 = vector.broadcast %4 : vector<1x8xf32> to vector<8x8xf32>
    %7 = arith.addf %5, %6 : vector<8x8xf32>
    %cst = arith.constant 0.000000e+00 : f32
    %8 = vector.broadcast %cst : f32 to vector<8x8xf32>
    %9 = arith.cmpf oge, %7, %8 : vector<8x8xf32>
    %cst_4 = arith.constant 0.00999999977 : f32
    %10 = vector.broadcast %cst_4 : f32 to vector<8x8xf32>
    %11 = arith.mulf %10, %7 : vector<8x8xf32>
    %12 = arith.select %9, %7, %11 : vector<8x8xi1>, vector<8x8xf32>
    %c0_5 = arith.constant 0 : index
    %c0_6 = arith.constant 0 : index
    %13 = vector.load %arg4[%c0_5, %c0_6] : memref<8x8xbf16, #tpu.memory_space<vmem>>, vector<8x8xbf16>
    %14 = arith.extf %13 : vector<8x8xbf16> to vector<8x8xf32>
    %15 = arith.addf %12, %14 : vector<8x8xf32>
    %c0_7 = arith.constant 0 : index
    %c0_8 = arith.constant 0 : index
    %16 = vector.load %arg7[%c0_7, %c0_8] : memref<8x1xf32, #tpu.memory_space<vmem>>, vector<8x1xf32>
    %cst_9 = arith.constant dense<0xFF800000> : vector<8xf32>
    %17 = vector.multi_reduction <maximumf>, %15, %cst_9 [1] : vector<8x8xf32> to vector<8xf32>
    %18 = vector.shape_cast %17 : vector<8xf32> to vector<8x1xf32>
    %19 = arith.maximumf %16, %18 : vector<8x1xf32>
    %20 = arith.subf %16, %19 : vector<8x1xf32>
    %21 = math.exp %20 : vector<8x1xf32>
    %22 = vector.broadcast %19 : vector<8x1xf32> to vector<8x8xf32>
    %23 = arith.subf %15, %22 : vector<8x8xf32>
    %24 = math.exp %23 : vector<8x8xf32>
    %c0_10 = arith.constant 0 : index
    %c0_11 = arith.constant 0 : index
    %25 = vector.load %arg8[%c0_10, %c0_11] : memref<8x1xf32, #tpu.memory_space<vmem>>, vector<8x1xf32>
    %26 = arith.mulf %21, %25 : vector<8x1xf32>
    %cst_12 = arith.constant dense<0.000000e+00> : vector<8xf32>
    %27 = vector.multi_reduction <add>, %24, %cst_12 [1] : vector<8x8xf32> to vector<8xf32>
    %28 = vector.shape_cast %27 : vector<8xf32> to vector<8x1xf32>
    %29 = arith.addf %26, %28 : vector<8x1xf32>
    %c0_13 = arith.constant 0 : index
    %c0_14 = arith.constant 0 : index
    %30 = vector.load %arg8[%c0_13, %c0_14] : memref<8x1xf32, #tpu.memory_space<vmem>>, vector<8x1xf32>
    tpu.vector_store %arg8[%c0_13, %c0_14], %29 {strides = array<i32>} : memref<8x1xf32, #tpu.memory_space<vmem>>, vector<8x1xf32>,
    %c0_15 = arith.constant 0 : index
    %c0_16 = arith.constant 0 : index
    %31 = vector.load %arg9[%c0_15, %c0_16] : memref<8x128xf32, #tpu.memory_space<vmem>>, vector<8x128xf32>
    %32 = vector.broadcast %21 : vector<8x1xf32> to vector<8x128xf32>
    %33 = arith.mulf %32, %31 : vector<8x128xf32>
    %c0_17 = arith.constant 0 : index
    %c0_18 = arith.constant 0 : index
    %34 = vector.load %arg5[%c0_17, %c0_18] : memref<8x128xf32, #tpu.memory_space<vmem>>, vector<8x128xf32>
    %cst_19 = arith.constant dense<0.000000e+00> : vector<8x128xf32>
    %35 = tpu.matmul %24, %34, %cst_19 {dimension_numbers = #tpu.dot_dimension_numbers<[1], [0], [0], [1], [0, 0, 1, 1], [], []>} : vector<8x8xf32>, vector<8x128xf32>, vector<8x128xf32> -> vector<8x128xf32>
    %36 = arith.addf %33, %35 : vector<8x128xf32>
    %c0_20 = arith.constant 0 : index
    %c0_21 = arith.constant 0 : index
    %37 = vector.load %arg9[%c0_20, %c0_21] : memref<8x128xf32, #tpu.memory_space<vmem>>, vector<8x128xf32>
    tpu.vector_store %arg9[%c0_20, %c0_21], %36 {strides = array<i32>} : memref<8x128xf32, #tpu.memory_space<vmem>>, vector<8x128xf32>,
    %c0_22 = arith.constant 0 : index
    %c0_23 = arith.constant 0 : index
    %38 = vector.load %arg7[%c0_22, %c0_23] : memref<8x1xf32, #tpu.memory_space<vmem>>, vector<8x1xf32>
    tpu.vector_store %arg7[%c0_22, %c0_23], %19 {strides = array<i32>} : memref<8x1xf32, #tpu.memory_space<vmem>>, vector<8x1xf32>,
    %c0_i32_24 = arith.constant 0 : i32
    %39 = arith.cmpi eq, %arg1, %c0_i32_24 : i32
    %40 = arith.extui %39 : i1 to i32
    %c0_i32_25 = arith.constant 0 : i32
    %41 = arith.cmpi ne, %40, %c0_i32_25 : i32
    scf.if %41 {
      %c0_26 = arith.constant 0 : index
      %c0_27 = arith.constant 0 : index
      %42 = vector.load %arg9[%c0_26, %c0_27] : memref<8x128xf32, #tpu.memory_space<vmem>>, vector<8x128xf32>
      %c0_28 = arith.constant 0 : index
      %c0_29 = arith.constant 0 : index
      %43 = vector.load %arg8[%c0_28, %c0_29] : memref<8x1xf32, #tpu.memory_space<vmem>>, vector<8x1xf32>
      %44 = tpu.reciprocal %43 : vector<8x1xf32> -> vector<8x1xf32>
      %45 = vector.broadcast %44 : vector<8x1xf32> to vector<8x128xf32>
      %46 = arith.mulf %42, %45 : vector<8x128xf32>
      %cst_30 = arith.constant 0.000000e+00 : f32
      %47 = vector.broadcast %cst_30 : f32 to vector<8x128xf32>
      %48 = arith.cmpf oge, %46, %47 : vector<8x128xf32>
      %cst_31 = arith.constant 0.00999999977 : f32
      %49 = vector.broadcast %cst_31 : f32 to vector<8x128xf32>
      %50 = arith.mulf %49, %46 : vector<8x128xf32>
      %51 = arith.select %48, %46, %50 : vector<8x128xi1>, vector<8x128xf32>
      %c0_32 = arith.constant 0 : index
      %c0_33 = arith.constant 0 : index
      %52 = vector.load %arg6[%c0_32, %c0_33] : memref<8x128xf32, #tpu.memory_space<vmem>>, vector<8x128xf32>
      tpu.vector_store %arg6[%c0_32, %c0_33], %51 {strides = array<i32>} : memref<8x128xf32, #tpu.memory_space<vmem>>, vector<8x128xf32>,
    } else {
    }
    return
  }
  func.func @transform_0(%arg0: i32, %arg1: i32) -> (i32, i32) {
    %c0_i32 = arith.constant 0 : i32
    %c0_i32_0 = arith.constant 0 : i32
    return %arg0, %c0_i32 : i32, i32
  }
  func.func @transform_1(%arg0: i32, %arg1: i32) -> (i32, i32) {
    %c0_i32 = arith.constant 0 : i32
    %c0_i32_0 = arith.constant 0 : i32
    return %c0_i32, %arg1 : i32, i32
  }
  func.func @transform_2(%arg0: i32, %arg1: i32) -> (i32, i32) {
    %c0_i32 = arith.constant 0 : i32
    return %arg0, %arg1 : i32, i32
  }
  func.func @transform_3(%arg0: i32, %arg1: i32) -> (i32, i32) {
    %c0_i32 = arith.constant 0 : i32
    %c0_i32_0 = arith.constant 0 : i32
    return %arg1, %c0_i32 : i32, i32
  }
  func.func @transform_4(%arg0: i32, %arg1: i32) -> (i32, i32) {
    %c0_i32 = arith.constant 0 : i32
    %c0_i32_0 = arith.constant 0 : i32
    return %arg0, %c0_i32 : i32, i32
  }
}

</mosaic_0001>

<bundles_post_ra>
// kernel: tpu_custom_call.1
= control target key start
LH: loop header
LB: loop body
LE: loop exit
PB: predicated region body
PF: predicated region fallthrough
CT: control target
= control target key end

     0   :  { %9 = vsyncpa [#allocation6], 0  ;;  %s282_s0 = inlined_call_operand.vmem [shape: f32[8,1], index: 0, kind: input, shape index: {}]   ;;  %s283_s1 = inlined_call_operand.vmem [shape: f32[1,8], index: 1, kind: input, shape index: {}]   ;;  %s284_s2 = inlined_call_operand.hbm [shape: bf16[8,8], index: 2, kind: input, shape index: {}]   ;;  %s285_s3 = inlined_call_operand.vmem [shape: f32[8,128], index: 3, kind: input, shape index: {}]   ;;  %s286_s4 = inlined_call_operand.hbm [shape: f32[8,128], index: 4, kind: output, shape index: {}]  }
   0x1   :  { %10 = vsyncpa [#allocation7], 0  ;;  %s20_s17 = sshll.u32 %s284_s2, 4  ;;  %s230_s18 = smov [#allocation5]   ;;  %s21_s17 = int_to_ptr.hbm [resolvable:$true] %s20_s17 }
   0x2   :  { %s22_s19 = sshll.u32 %s230_s18, 4  ;;  %s23_s19 = int_to_ptr.vmem [resolvable:$true] %s22_s19 }
   0x3   :  { %25 = dma.hbm_to_vmem [thread:$0]  %s21_s17, 64, %s23_s19, [#allocation6]  }
   0x4   :  { %226 = dma.done.wait [#allocation6], 64  }
   0x5   :  { %227 = vsyncadd [#allocation6], 4294967232  ;;  %v231_v0 = vmov 0   ;;  %v40_v1 = vld [vmem:[%s282_s0] sm:$0xff]  ;;  %vm36_vm0 = vcmask 7168   ;;  %v232_v2 = vmov -inf  }
   0x6   :  { %168 = vset.pattern.permute.xlu0 %v231_v0  ;;  %169 = vset.pattern.permute.xlu1 %v231_v0  ;;  %37 = vst.msk [vmem:[#allocation2] sm:$0xff] %vm36_vm0, %v232_v2  ;;  %v171_v3 = vld [vmem:[%s283_s1] ss:$0 sm:$0xff]  ;;  %v54_v4 = vld [vmem:[#allocation5] sm:$0xf]  ;;  %vm58_vm2 = vcmask 64512  }
   0x7   :  { %170 = vset.pattern.permute.xlu2 %v231_v0  ;;  %44 = vperm.xlu0 %168, %v40_v1   ;;  %v55_v7 = vunpack.c.l.bf16 %v54_v4  ;;  %v233_v12 = vmov 0.0   ;;  %v89_v19 = vld [vmem:[%s285_s3] sm:$0xff]  ;;  %s234_s3 = smov [#allocation8]   ;;  %s152_s26 = sshll.u32 %s286_s4, 4  ;;  %s153_s26 = int_to_ptr.hbm [resolvable:$true] %s152_s26 }
   0x8   :  { %38 = vst.msk [vmem:[#allocation3] sm:$0xff] %vm36_vm0, %v233_v12  ;;  %108 = vmatpush.msra.mxu0 %v89_v19  ;;  %s150_s23 = sshll.u32 %s234_s3, 4  ;;  %s151_s23 = int_to_ptr.vmem [resolvable:$true] %s150_s23 }
   0xd   :  { %v57_v13 = vld [vmem:[#allocation2] sm:$0xff] }
   0xf   :  { %v74_v25 = vld [vmem:[#allocation3] sm:$0xff] }
  0x79   :  { %v45_v5 = vpop.permute.xlu0 %44 }
  0x7a   :  { %v50_v6 = vadd.f32 %v171_v3, %v45_v5 }
  0x7c   :  { %vm51_vm1 = vcmp.ge.f32.partialorder %v50_v6, 0.0  ;;  %v52_v8 = vmul.f32 0.01, %v50_v6 }
  0x7e   :  { %v53_v9 = vsel %vm51_vm1, %v50_v6, %v52_v8 }
  0x7f   :  { %v56_v10 = vadd.f32 %v55_v7, %v53_v9 }
  0x81   :  { %v59_v11 = vsel %vm58_vm2, %v56_v10, -inf }
  0x82   :  { %60 = vmax.xlane.f32.xlu0 %v59_v11 }
  0xf5   :  { %v61_v14 = vpop.xlane.xlu0 %60 }
  0xf6   :  { %v62_v15 = vmax.f32 %v57_v13, %v61_v14 }
  0xf8   :  { %v63_v16 = vsub.f32 %v57_v13, %v62_v15  ;;  %115 = vst.msk [vmem:[#allocation2] sm:$0xff] %vm36_vm0, %v62_v15  ;;  %68 = vperm.xlu1 %169, %v62_v15  }
  0xfa   :  { %v64_v17 = vmul.f32 1.442695, %v63_v16 }
  0xfc   :  { %172 = vpow2.f32 %v64_v17 }
 0x102   :  { %v173_v18 = vpop.eup %172 }
 0x103   :  { %85 = vperm.xlu2 %170, %v173_v18   ;;  %v75_v26 = vmul.f32 %v173_v18, %v74_v25 }
 0x15d   :  { %v86_v40 = vpop.permute.xlu2 %85 }
 0x15e   :  { %v88_v42 = vmul.f32 0.0, %v86_v40 }
 0x16a   :  { %v69_v20 = vpop.permute.xlu1 %68 }
 0x16b   :  { %v71_v21 = vsub.f32 %v56_v10, %v69_v20 }
 0x16d   :  { %v72_v22 = vmul.f32 1.442695, %v71_v21 }
 0x16f   :  { %174 = vpow2.f32 %v72_v22 }
 0x175   :  { %v175_v23 = vpop.eup %174 }
 0x176   :  { %162 = vmatmul.msk.f32.vlgmr.msra.gmra.mxu0 %vm58_vm2, %v175_v23  ;;  %v76_v24 = vsel %vm58_vm2, %v175_v23, 0.0 }
 0x177   :  { %77 = vadd.xlane.f32.xlu1 %v76_v24 }
 0x1ea   :  { %v78_v27 = vpop.xlane.xlu1 %77 }
 0x1eb   :  { %v79_v28 = vadd.f32 %v78_v27, %v75_v26 }
 0x1ed   :  { %81 = vst.msk [vmem:[#allocation3] sm:$0xff] %vm36_vm0, %v79_v28 }
 0x1f3   :  { %v110_v41 = vpop.f32.mrf.mxu0 }
 0x1f4   :  { %v120_v29 = vld [vmem:[#allocation3] sm:$0xff]  ;;  %v113_v43 = vadd.f32 %v110_v41, %v88_v42 }
 0x1f5   :  { %176 = vrcp.f32 %v120_v29  ;;  %v132_v33 = vand.u32 2147483648, %v120_v29  ;;  %v130_v35 = vand.u32 2147483647, %v120_v29  ;;  %vm126_vm4 = vweird.f32 %v120_v29 }
 0x1f7   :  { %v133_v37 = vor.u32 1.1754944e-38, %v132_v33  ;;  %vm131_vm6 = vcmp.eq.f32.partialorder %v130_v35, 8.507059e+37 }
 0x1fb   :  { %v177_v30 = vpop.eup %176 }
 0x1fc   :  { %v122_v31 = vmul.f32 %v177_v30, %v120_v29  ;;  %vm127_vm3 = vweird.f32 %v177_v30 }
 0x1fd   :  { %vm128_vm5 = vmor %vm126_vm4, %vm127_vm3 }
 0x1fe   :  { %v123_v32 = vsub.f32 1.0, %v122_v31 }
 0x200   :  { %v124_v34 = vmul.f32 %v177_v30, %v123_v32 }
 0x202   :  { %v125_v36 = vadd.f32 %v177_v30, %v124_v34 }
 0x204   :  { %v129_v38 = vsel %vm128_vm5, %v177_v30, %v125_v36 }
 0x205   :  { %v134_v39 = vsel %vm131_vm6, %v133_v37, %v129_v38 }
 0x206   :  { %137 = vperm.xlu2 %170, %v134_v39  }
 0x260   :  { %v138_v44 = vpop.permute.xlu2 %137 }
 0x261   :  { %v140_v45 = vmul.f32 %v138_v44, %v113_v43 }
 0x263   :  { %vm141_vm7 = vcmp.ge.f32.partialorder %v140_v45, 0.0  ;;  %v142_v46 = vmul.f32 0.01, %v140_v45 }
 0x265   :  { %v143_v47 = vsel %vm141_vm7, %v140_v45, %v142_v46 }
 0x266   :  { %144 = vst [vmem:[#allocation8] sm:$0xff] %v143_v47 }
 0x267   :  { %155 = dma.vmem_to_hbm [thread:$0]  %s151_s23, 128, %s153_s26, [#allocation7]  }
 0x268   :  { %228 = dma.done.wait [#allocation7], 128  }
 0x269   :  { %229 = vsyncadd [#allocation7], 4294967168 }
 0x26a   :  { %160 = vsyncpa [#allocation6], 1 }
 0x26b   :  { %161 = vsyncpa [#allocation7], 1 }

</bundles_post_ra>
